<compile_context>
chip_gen: v6e
topology: v6e:2x2x1
jax: 0.10.0
libtpu: 0.0.40
codegen_flags: <defaults>
</compile_context>

<pallas_src>
import jax
import jax.numpy as jnp
from jax.experimental import pallas as pl
from jax.experimental.pallas import tpu as pltpu


def _sc_kernel(x_ref, y_ref, dsq_ref, ysq_ref):
    # x_ref / y_ref: (NS, R, 128) lane-dense tile covering NS whole samples.
    x = x_ref[...].astype(jnp.float32)
    y = y_ref[...].astype(jnp.float32)
    d = y - x
    # Per-sample squared Frobenius norms: lane reduce (XLU) then sublane reduce.
    dsq = jnp.sum(jnp.sum(d * d, axis=-1, keepdims=True), axis=-2, keepdims=True)  # (NS,1,1)
    ysq = jnp.sum(jnp.sum(y * y, axis=-1, keepdims=True), axis=-2, keepdims=True)  # (NS,1,1)
    # Broadcast only along the lane dim of the tiny output tile (no relayout).
    dsq_ref[...] = jnp.broadcast_to(dsq, dsq_ref.shape)
    ysq_ref[...] = jnp.broadcast_to(ysq, ysq_ref.shape)


def _per_sample_sq_norms(x, y):
    """x, y: (N, T, F). Returns (sum (y-x)^2, sum y^2) per sample, each (N,) f32."""
    N, T, F = x.shape
    L = T * F
    R = pl.cdiv(L, 128)
    pad_l = R * 128 - L

    # Lane-dense layout: (N, T, F) -> (N, R, 128), zero-padded (safe for both norms).
    x2 = x.reshape(N, L)
    y2 = y.reshape(N, L)
    if pad_l:
        x2 = jnp.pad(x2, ((0, 0), (0, pad_l)))
        y2 = jnp.pad(y2, ((0, 0), (0, pad_l)))
    x3 = x2.reshape(N, R, 128)
    y3 = y2.reshape(N, R, 128)

    # Samples per grid step: 2 inputs x 2 pipeline buffers x NS*R*128*4 B <= ~8 MiB,
    # which is comfortably under the scoped-VMEM defaults on v5e/v6e/v7x.
    bytes_per_sample_per_buf = R * 128 * 4
    ns = max(1, min(N, (8 * 1024 * 1024) // (4 * bytes_per_sample_per_buf)))
    G = pl.cdiv(N, ns)
    n_pad = G * ns
    if n_pad != N:
        # Zero-padded samples contribute dsq=ysq=0 and are sliced off below.
        x3 = jnp.pad(x3, ((0, n_pad - N), (0, 0), (0, 0)))
        y3 = jnp.pad(y3, ((0, n_pad - N), (0, 0), (0, 0)))

    out_shape = (
        jax.ShapeDtypeStruct((n_pad, 1, 128), jnp.float32),  # sum (y-x)^2
        jax.ShapeDtypeStruct((n_pad, 1, 128), jnp.float32),  # sum y^2
    )
    dsq, ysq = pl.pallas_call(
        _sc_kernel,
        out_shape=out_shape,
        grid_spec=pltpu.PrefetchScalarGridSpec(
            num_scalar_prefetch=0,
            grid=(G,),
            in_specs=[
                pl.BlockSpec((ns, R, 128), lambda i: (i, 0, 0)),
                pl.BlockSpec((ns, R, 128), lambda i: (i, 0, 0)),
            ],
            out_specs=[
                pl.BlockSpec((ns, 1, 128), lambda i: (i, 0, 0)),
                pl.BlockSpec((ns, 1, 128), lambda i: (i, 0, 0)),
            ],
        ),
        compiler_params=pltpu.CompilerParams(
            dimension_semantics=("parallel",),
            vmem_limit_bytes=32 * 1024 * 1024,
        ),
    )(x3, y3)
    return dsq[:N, 0, 0], ysq[:N, 0, 0]


def spectral_convergence_loss(x_mag_list, y_mag_list, sentence_avg):
    """Pallas equivalent of SpectralConvergenceLoss.forward.

    x_mag_list / y_mag_list: lists of (frames, freq_bins) arrays (equal shapes here).
    sentence_avg: bool. If False, each sample's loss is weighted by its #frames.
    """
    # TODO(synk): variable-length samples would need per-sample zero padding to a
    # common (T, F) plus true per-sample frame counts for the weighting; here all
    # list elements share one shape so we simply stack them.
    x = jnp.stack(x_mag_list)  # (N, T, F)
    y = jnp.stack(y_mag_list)  # (N, T, F)
    dsq, ysq = _per_sample_sq_norms(x, y)
    # No eps guard on ysq, matching the PyTorch reference semantics exactly.
    per_sample = jnp.sqrt(dsq) / jnp.sqrt(ysq)
    if not sentence_avg:
        per_sample = per_sample * y.shape[1]  # len(y_mag) == #frames
    return jnp.sum(per_sample)


def _reference(x_mag_list, y_mag_list, sentence_avg):
    loss = 0.0
    for x_mag, y_mag in zip(x_mag_list, y_mag_list):
        one = jnp.linalg.norm(y_mag - x_mag) / jnp.linalg.norm(y_mag)
        loss = loss + (one if sentence_avg else one * y_mag.shape[0])
    return loss


if __name__ == "__main__":
    key = jax.random.PRNGKey(0)
    N, T, F = 2, 16, 80  # 2 samples, 16 frames, 80 freq bins
    kx, ky = jax.random.split(key)
    # Magnitude spectrograms are non-negative.
    x_list = [jnp.abs(jax.random.normal(jax.random.fold_in(kx, i), (T, F), jnp.float32))
              for i in range(N)]
    y_list = [jnp.abs(jax.random.normal(jax.random.fold_in(ky, i), (T, F), jnp.float32))
              for i in range(N)]

    loss_avg = jax.block_until_ready(spectral_convergence_loss(x_list, y_list, True))
    loss_sum = jax.block_until_ready(spectral_convergence_loss(x_list, y_list, False))

    ref_avg = _reference(x_list, y_list, True)
    ref_sum = _reference(x_list, y_list, False)

    assert jnp.allclose(loss_avg, ref_avg, rtol=1e-5, atol=1e-5), (loss_avg, ref_avg)
    assert jnp.allclose(loss_sum, ref_sum, rtol=1e-5, atol=1e-5), (loss_sum, ref_sum)

    print("KERNEL_OK")
</pallas_src>

<mosaic_0001>
module attributes {stable_mosaic.version = 11 : i64} {
  func.func @_sc_kernel(%arg0: i32, %arg1: memref<2x10x128xf32, #tpu.memory_space<vmem>>, %arg2: memref<2x10x128xf32, #tpu.memory_space<vmem>>, %arg3: memref<2x1x128xf32, #tpu.memory_space<vmem>>, %arg4: memref<2x1x128xf32, #tpu.memory_space<vmem>>) attributes {dimension_semantics = [#tpu.dimension_semantics<parallel>], iteration_bounds = array<i64: 1>, scalar_prefetch = 0 : i64, scratch_operands = 0 : i64, tpu.core_type = #tpu.core_type<tc>, window_params = [{transform_indices = @transform_0, window_bounds = array<i64: 2, 10, 128>}, {transform_indices = @transform_1, window_bounds = array<i64: 2, 10, 128>}, {transform_indices = @transform_2, window_bounds = array<i64: 2, 1, 128>}, {transform_indices = @transform_3, window_bounds = array<i64: 2, 1, 128>}]} {
    %c0 = arith.constant 0 : index
    %c0_0 = arith.constant 0 : index
    %c0_1 = arith.constant 0 : index
    %0 = vector.load %arg1[%c0, %c0_0, %c0_1] : memref<2x10x128xf32, #tpu.memory_space<vmem>>, vector<2x10x128xf32>
    %c0_2 = arith.constant 0 : index
    %c0_3 = arith.constant 0 : index
    %c0_4 = arith.constant 0 : index
    %1 = vector.load %arg2[%c0_2, %c0_3, %c0_4] : memref<2x10x128xf32, #tpu.memory_space<vmem>>, vector<2x10x128xf32>
    %2 = arith.subf %1, %0 : vector<2x10x128xf32>
    %3 = arith.mulf %2, %2 : vector<2x10x128xf32>
    %cst = arith.constant dense<0.000000e+00> : vector<2x10xf32>
    %4 = vector.multi_reduction <add>, %3, %cst [2] : vector<2x10x128xf32> to vector<2x10xf32>
    %5 = vector.shape_cast %4 : vector<2x10xf32> to vector<2x10x1xf32>
    %cst_5 = arith.constant dense<0.000000e+00> : vector<2x1xf32>
    %6 = vector.multi_reduction <add>, %5, %cst_5 [1] : vector<2x10x1xf32> to vector<2x1xf32>
    %7 = vector.shape_cast %6 : vector<2x1xf32> to vector<2x1x1xf32>
    %8 = arith.mulf %1, %1 : vector<2x10x128xf32>
    %cst_6 = arith.constant dense<0.000000e+00> : vector<2x10xf32>
    %9 = vector.multi_reduction <add>, %8, %cst_6 [2] : vector<2x10x128xf32> to vector<2x10xf32>
    %10 = vector.shape_cast %9 : vector<2x10xf32> to vector<2x10x1xf32>
    %cst_7 = arith.constant dense<0.000000e+00> : vector<2x1xf32>
    %11 = vector.multi_reduction <add>, %10, %cst_7 [1] : vector<2x10x1xf32> to vector<2x1xf32>
    %12 = vector.shape_cast %11 : vector<2x1xf32> to vector<2x1x1xf32>
    %13 = vector.shape_cast %7 : vector<2x1x1xf32> to vector<2x1x1xf32>
    %14 = vector.broadcast %13 : vector<2x1x1xf32> to vector<2x1x128xf32>
    %c0_8 = arith.constant 0 : index
    %c0_9 = arith.constant 0 : index
    %c0_10 = arith.constant 0 : index
    %15 = vector.load %arg3[%c0_8, %c0_9, %c0_10] : memref<2x1x128xf32, #tpu.memory_space<vmem>>, vector<2x1x128xf32>
    tpu.vector_store %arg3[%c0_8, %c0_9, %c0_10], %14 {strides = array<i32>} : memref<2x1x128xf32, #tpu.memory_space<vmem>>, vector<2x1x128xf32>,
    %16 = vector.shape_cast %12 : vector<2x1x1xf32> to vector<2x1x1xf32>
    %17 = vector.broadcast %16 : vector<2x1x1xf32> to vector<2x1x128xf32>
    %c0_11 = arith.constant 0 : index
    %c0_12 = arith.constant 0 : index
    %c0_13 = arith.constant 0 : index
    %18 = vector.load %arg4[%c0_11, %c0_12, %c0_13] : memref<2x1x128xf32, #tpu.memory_space<vmem>>, vector<2x1x128xf32>
    tpu.vector_store %arg4[%c0_11, %c0_12, %c0_13], %17 {strides = array<i32>} : memref<2x1x128xf32, #tpu.memory_space<vmem>>, vector<2x1x128xf32>,
    return
  }
  func.func @transform_0(%arg0: i32) -> (i32, i32, i32) {
    %c0_i32 = arith.constant 0 : i32
    %c0_i32_0 = arith.constant 0 : i32
    %c0_i32_1 = arith.constant 0 : i32
    return %arg0, %c0_i32, %c0_i32_0 : i32, i32, i32
  }
  func.func @transform_1(%arg0: i32) -> (i32, i32, i32) {
    %c0_i32 = arith.constant 0 : i32
    %c0_i32_0 = arith.constant 0 : i32
    %c0_i32_1 = arith.constant 0 : i32
    return %arg0, %c0_i32, %c0_i32_0 : i32, i32, i32
  }
  func.func @transform_2(%arg0: i32) -> (i32, i32, i32) {
    %c0_i32 = arith.constant 0 : i32
    %c0_i32_0 = arith.constant 0 : i32
    %c0_i32_1 = arith.constant 0 : i32
    return %arg0, %c0_i32, %c0_i32_0 : i32, i32, i32
  }
  func.func @transform_3(%arg0: i32) -> (i32, i32, i32) {
    %c0_i32 = arith.constant 0 : i32
    %c0_i32_0 = arith.constant 0 : i32
    %c0_i32_1 = arith.constant 0 : i32
    return %arg0, %c0_i32, %c0_i32_0 : i32, i32, i32
  }
}

</mosaic_0001>

<bundles_post_ra>
// kernel: tpu_custom_call.1
= control target key start
LH: loop header
LB: loop body
LE: loop exit
PB: predicated region body
PF: predicated region fallthrough
CT: control target
= control target key end

     0   :  { %9 = vsyncpa [#allocation3], 0  ;;  %vm33_vm0 = vcmask 1041408   ;;  %s234_s0 = inlined_call_operand.vmem [shape: f32[2,10,128], index: 0, kind: input, shape index: {}]   ;;  %s235_s1 = inlined_call_operand.vmem [shape: f32[2,10,128], index: 1, kind: input, shape index: {}]   ;;  %s236_s2 = inlined_call_operand.hbm [shape: f32[2,1,128], index: 2, kind: output, shape index: {0}]   ;;  %s237_s3 = inlined_call_operand.hbm [shape: f32[2,1,128], index: 3, kind: output, shape index: {1}]  }
   0x1   :  { %v20_v0 = vld [vmem:[%s235_s1 + $0x8] sm:$0x3]  ;;  %v17_v2 = vld [vmem:[%s234_s0 + $0x10] sm:$0xff]  ;;  %v22_v5 = vld [vmem:[%s235_s1 + $0x18] sm:$0x3] }
   0x2   :  { %v16_v1 = vld [vmem:[%s234_s0 + $0x8] sm:$0x3]  ;;  %v59_v3 = vmul.f32 %v20_v0, %v20_v0  ;;  %v18_v6 = vld [vmem:[%s234_s0 + $0x18] sm:$0x3]  ;;  %v21_v7 = vld [vmem:[%s235_s1 + $0x10] sm:$0xff]  ;;  %v61_v8 = vmul.f32 %v22_v5, %v22_v5 }
   0x3   :  { %v24_v4 = vsub.f32 %v20_v0, %v16_v1  ;;  %v26_v9 = vsub.f32 %v22_v5, %v18_v6 }
   0x4   :  { %10 = vsyncpa [#allocation5], 0  ;;  %v64_v10 = vsel %vm33_vm0, %v59_v3, 0.0  ;;  %v15_v12 = vld [vmem:[%s234_s0] sm:$0xff]  ;;  %v25_v15 = vsub.f32 %v21_v7, %v17_v2  ;;  %v69_v17 = vsel %vm33_vm0, %v61_v8, 0.0  ;;  %v60_v22 = vmul.f32 %v21_v7, %v21_v7  ;;  %s172_s0 = smov [#allocation2]  }
   0x5   :  { %v28_v11 = vmul.f32 %v24_v4, %v24_v4  ;;  %v19_v13 = vld [vmem:[%s235_s1] sm:$0xff]  ;;  %65 = vadd.xlane.f32.xlu1 %v64_v10  ;;  %v30_v14 = vmul.f32 %v26_v9, %v26_v9  ;;  %s97_s1 = sshll.u32 %s172_s0, 4  ;;  %s173_s28 = smov [#allocation4]   ;;  %s98_s1 = int_to_ptr.vmem [resolvable:$true] %s97_s1 }
   0x6   :  { %v23_v18 = vsub.f32 %v19_v13, %v15_v12  ;;  %v29_v20 = vmul.f32 %v25_v15, %v25_v15  ;;  %v58_v23 = vmul.f32 %v19_v13, %v19_v13  ;;  %s109_s29 = sshll.u32 %s173_s28, 4  ;;  %s128_s30 = scalar_lea.vmem %s98_s1, 32  ;;  %s110_s29 = int_to_ptr.vmem [resolvable:$true] %s109_s29 }
   0x7   :  { %v34_v16 = vsel %vm33_vm0, %v28_v11, 0.0  ;;  %v39_v19 = vsel %vm33_vm0, %v30_v14, 0.0  ;;  %p129_p0 = scmp.ne.s32.totalorder %s98_s1, %s128_s30  ;;  %p133_p1 = scmp.lt.s32.totalorder %s98_s1, %s98_s1 }
   0x8   :  { %35 = vadd.xlane.f32.xlu0 %v34_v16  ;;  %v27_v21 = vmul.f32 %v23_v18, %v23_v18  ;;  %p134_p2 = scmp.lt.s32.totalorder %s128_s30, %s128_s30 }
   0x9   :  { %70 = vadd.xlane.f32.xlu1 %v69_v17 }
   0xa   :  { %p135_p3 = por %p134_p2, %p133_p1 }
   0xc   :  { %40 = vadd.xlane.f32.xlu0 %v39_v19  ;;  %p136_p4 = pnand %p135_p3, %p129_p0 }
   0xd   :  { %37 = vadd.xlane.f32.xlu1 %v29_v20 }
  0x10   :  { %31 = vadd.xlane.f32.xlu0 %v27_v21 }
  0x11   :  { %67 = vadd.xlane.f32.xlu1 %v60_v22 }
  0x14   :  { %62 = vadd.xlane.f32.xlu0 %v58_v23 }
  0x8e   :  { %v66_v24 = vpop.xlane.xlu1 %65 }
  0x8f   :  { %v72_v40 = vsel %vm33_vm0, %v66_v24, 0.0 }
  0x91   :  { %v36_v25 = vpop.xlane.xlu0 %35 }
  0x92   :  { %v71_v26 = vpop.xlane.xlu1 %70  ;;  %v42_v31 = vsel %vm33_vm0, %v36_v25, 0.0 }
  0x93   :  { %v80_v35 = vsel %vm33_vm0, %v71_v26, 0.0 }
  0x95   :  { %v41_v27 = vpop.xlane.xlu0 %40 }
  0x96   :  { %v50_v28 = vsel %vm33_vm0, %v41_v27, 0.0  ;;  %v38_v29 = vpop.xlane.xlu1 %37 }
  0x97   :  { %v51_v30 = vadd.f32 %v50_v28, %v38_v29 }
  0x99   :  { %v32_v32 = vpop.xlane.xlu0 %31  ;;  %v52_v33 = vrot.slane %v51_v30, 4 }
  0x9a   :  { %v43_v34 = vadd.f32 %v42_v31, %v32_v32  ;;  %v68_v36 = vpop.xlane.xlu1 %67 }
  0x9b   :  { %v53_v37 = vadd.f32 %v52_v33, %v51_v30  ;;  %v81_v39 = vadd.f32 %v80_v35, %v68_v36 }
  0x9c   :  { %v44_v38 = vrot.slane %v43_v34, 4 }
  0x9d   :  { %v63_v41 = vpop.xlane.xlu0 %62  ;;  %v54_v42 = vrot.slane %v53_v37, 2  ;;  %v82_v44 = vrot.slane %v81_v39, 4 }
  0x9e   :  { %v45_v43 = vadd.f32 %v44_v38, %v43_v34  ;;  %v73_v45 = vadd.f32 %v72_v40, %v63_v41 }
  0x9f   :  { %v55_v46 = vadd.f32 %v54_v42, %v53_v37  ;;  %v83_v48 = vadd.f32 %v82_v44, %v81_v39 }
  0xa0   :  { %v46_v47 = vrot.slane %v45_v43, 2  ;;  %v74_v49 = vrot.slane %v73_v45, 4 }
  0xa1   :  { %v56_v50 = vrot.slane %v55_v46, 1  ;;  %v84_v52 = vrot.slane %v83_v48, 2 }
  0xa2   :  { %v47_v51 = vadd.f32 %v46_v47, %v45_v43  ;;  %v75_v53 = vadd.f32 %v74_v49, %v73_v45 }
  0xa3   :  { %v85_v55 = vadd.f32 %v84_v52, %v83_v48  ;;  %v57_v57 = vadd.f32 %v56_v50, %v55_v46 }
  0xa4   :  { %v48_v54 = vrot.slane %v47_v51, 1  ;;  %v76_v56 = vrot.slane %v75_v53, 2 }
  0xa5   :  { %v86_v58 = vrot.slane %v85_v55, 1  ;;  %89 = vst [vmem:[#allocation2 + $0x1] sm:$0x1] %v57_v57 }
  0xa6   :  { %v77_v59 = vadd.f32 %v76_v56, %v75_v53  ;;  %v49_v60 = vadd.f32 %v48_v54, %v47_v51 }
  0xa7   :  { %v87_v61 = vadd.f32 %v86_v58, %v85_v55 }
  0xa8   :  { %v78_v62 = vrot.slane %v77_v59, 1  ;;  %88 = vst [vmem:[#allocation2] sm:$0x1] %v49_v60 }
  0xa9   :  { %139 = shalt.err (!%p136_p4)
}
  0xaa   :  { %s174_s4 = smov 16   ;;  %s175_s5 = smov 1   ;;  %91 = vst [vmem:[#allocation4 + $0x1] sm:$0x1] %v87_v61  ;;  %v79_v63 = vadd.f32 %v78_v62, %v77_v59 }
  0xab   :  { %103 = dma.vmem_to_hbm [thread:$0]  %s98_s1, 32, %s236_s2, [#allocation3], %s174_s4, %s174_s4, %s175_s5  }
  0xac   :  { %90 = vst [vmem:[#allocation4] sm:$0x1] %v79_v63  ;;  %s148_s8 = scalar_lea.vmem %s110_s29, 32  ;;  %p153_p6 = scmp.lt.s32.totalorder %s110_s29, %s110_s29 }
  0xad   :  { %p149_p5 = scmp.ne.s32.totalorder %s110_s29, %s148_s8  ;;  %p154_p7 = scmp.lt.s32.totalorder %s148_s8, %s148_s8 }
  0xaf   :  { %p155_p8 = por %p154_p7, %p153_p6 }
  0xb1   :  { %p156_p9 = pnand %p155_p8, %p149_p5 }
  0xb3   :  { %159 = shalt.err (!%p156_p9)
}
  0xb4   :  { %115 = dma.vmem_to_hbm [thread:$0]  %s110_s29, 32, %s237_s3, [#allocation5], %s174_s4, %s174_s4, %s175_s5  }
  0xb5   :  { %168 = dma.done.wait [#allocation3], 32  }
  0xb6   :  { %169 = vsyncadd [#allocation3], 4294967264 }
  0xb7   :  { %170 = dma.done.wait [#allocation5], 32  }
  0xb8   :  { %171 = vsyncadd [#allocation5], 4294967264 }
  0xb9   :  { %122 = vsyncpa [#allocation3], 1 }
  0xba   :  { %123 = vsyncpa [#allocation5], 1 }

</bundles_post_ra>
